<compile_context>
chip_gen: v7x
topology: tpu7x:2x2x1
jax: 0.10.0
libtpu: 0.0.40
codegen_flags: <defaults>
</compile_context>

<pallas_src>
import jax
import jax.numpy as jnp
from jax.experimental import pallas as pl
from jax.experimental.pallas import tpu as pltpu

_MAX_BATCH_BLOCK = 256  # batch tile when B is large (multiple of 8, fills MXU rows)


# ----------------------------------------------------------------------------
# Fused kernel: bidirectional-LSTM last-step features + FC head.
# Gate order follows PyTorch: i, f, g, o.
# ----------------------------------------------------------------------------
def _bilstm_head_kernel(x_ref, wih_ref, whh_ref, w1_ref, small_ref, o_ref,
                        hcat_ref):
    T, Bb, _ = x_ref.shape
    H = whh_ref.shape[0]
    G = 4 * H
    hid = w1_ref.shape[1]
    O = o_ref.shape[1]

    wih = wih_ref[...]                       # (Dp, 8H): [Wih_f | Wih_b]
    ball = small_ref[0:1, :]                 # (1, 8H): [b_ih_f+b_hh_f | b_ih_b+b_hh_b]

    # Input->gate terms for every timestep and BOTH directions, biases pre-added.
    # T small MXU passes, all OFF the recurrent critical path.
    xg = [jnp.dot(x_ref[t], wih, preferred_element_type=jnp.float32) + ball
          for t in range(T)]                 # each (Bb, 8H)

    # Forward direction: full T-step recurrence (statically unrolled; T is small).
    # Only the h @ Whh matmul is on the serial dependency chain.
    whh = whh_ref[...]                       # loop-invariant; loaded once
    h = jnp.zeros((Bb, H), jnp.float32)
    c = jnp.zeros((Bb, H), jnp.float32)
    for t in range(T):
        gates = xg[t][:, :G] + jnp.dot(h, whh, preferred_element_type=jnp.float32)
        sig = jax.nn.sigmoid(gates)          # full-(B,4H)-vreg EUP ops, then slice
        th = jnp.tanh(gates)
        i_g = sig[:, 0 * H:1 * H]
        f_g = sig[:, 1 * H:2 * H]
        g_g = th[:, 2 * H:3 * H]
        o_g = sig[:, 3 * H:4 * H]
        c = f_g * c + i_g * g_g
        h = o_g * jnp.tanh(c)
    h_fwd = h

    # Backward direction: out[:, -1, H:] is ONE cell step on x_{T-1} from zero
    # state (c0 = 0, so the forget-gate term drops out; Whh_b never contributes).
    gates_b = xg[T - 1][:, G:]
    sig_b = jax.nn.sigmoid(gates_b)
    th_b = jnp.tanh(gates_b)
    c_b = sig_b[:, 0 * H:1 * H] * th_b[:, 2 * H:3 * H]
    h_bwd = sig_b[:, 3 * H:4 * H] * jnp.tanh(c_b)

    # FC head: lane-concat both directions in a VMEM scratch, then ONE K=2H matmul
    # (instead of two K=H passes), ReLU, output projection.
    hcat_ref[:, :H] = h_fwd
    hcat_ref[:, H:] = h_bwd
    b1 = small_ref[1:2, 0:hid]
    hid_act = jnp.maximum(
        jnp.dot(hcat_ref[...], w1_ref[...], preferred_element_type=jnp.float32) + b1,
        0.0)
    # TODO(synk): Dropout(p=0.2) is identity in eval mode; not applied here.

    w2 = small_ref[2:2 + O, 0:hid]           # PyTorch Linear (O, hid) layout
    b2 = small_ref[2 + O:3 + O, 0:O]
    if O == 1:
        # hid -> 1 projection via VPU multiply + lane reduce (skip an N=1 MXU pass).
        out = jnp.sum(hid_act * w2, axis=-1, keepdims=True) + b2
    else:
        out = jax.lax.dot_general(hid_act, w2, (((1,), (1,)), ((), ())),
                                  preferred_element_type=jnp.float32) + b2
    o_ref[...] = out.astype(o_ref.dtype)


def _fused_call(x_tm, p):
    T, B, Dp = x_tm.shape
    H = p["whh"].shape[0]
    G = 4 * H
    hid = p["w1"].shape[1]
    O = p["small"].shape[0] - 3

    if B <= _MAX_BATCH_BLOCK:
        Bb = B
    else:
        Bb = _MAX_BATCH_BLOCK
        assert B % Bb == 0, "large batches must be a multiple of the batch tile"
    grid = (B // Bb,)

    return pl.pallas_call(
        _bilstm_head_kernel,
        out_shape=jax.ShapeDtypeStruct((B, O), jnp.float32),
        grid_spec=pltpu.PrefetchScalarGridSpec(
            num_scalar_prefetch=0,
            grid=grid,
            in_specs=[
                pl.BlockSpec((T, Bb, Dp), lambda b: (0, b, 0)),     # x (time-major)
                pl.BlockSpec((Dp, 2 * G), lambda b: (0, 0)),        # [Wih_f | Wih_b]
                pl.BlockSpec((H, G), lambda b: (0, 0)),             # Whh_f
                pl.BlockSpec((2 * H, hid), lambda b: (0, 0)),       # W1 (pre-transposed)
                pl.BlockSpec((3 + O, 2 * G), lambda b: (0, 0)),     # packed small params
            ],
            out_specs=pl.BlockSpec((Bb, O), lambda b: (b, 0)),
            scratch_shapes=[pltpu.VMEM((Bb, 2 * H), jnp.float32)],  # [h_fwd | h_bwd]
        ),
        compiler_params=pltpu.CompilerParams(
            dimension_semantics=("parallel",)),
    )(x_tm, p["wih_all"], p["whh"], p["w1"], p["small"])


@jax.jit
def bilstm_regressor_forward(x, params):
    """x: (B, T, D) batch-first, like the PyTorch module."""
    B, T, D = x.shape
    Dp = params["wih_all"].shape[0]
    x_tm = jnp.transpose(x, (1, 0, 2))       # time-major: step t is a contiguous block
    if Dp != D:
        x_tm = jnp.pad(x_tm, ((0, 0), (0, 0), (0, Dp - D)))   # zero-padded feature dim
    return _fused_call(x_tm, params)


# ----------------------------------------------------------------------------
# Deterministic parameter init (PyTorch-style uniform(-1/sqrt(fan), 1/sqrt(fan)))
# stored in kernel-friendly precomputed layouts.
# ----------------------------------------------------------------------------
def init_params(key, input_size, rnn_size, hidden_size, output_size, seq_len):
    D, H, T, O = input_size, rnn_size, seq_len, output_size
    G = 4 * H
    Dp = ((D + 7) // 8) * 8                  # sublane-aligned K for the gate matmuls
    del T                                    # T is carried by the input, not the params
    kk = jax.random.split(key, 11)

    def u(k_, shape, bound):
        return jax.random.uniform(k_, shape, jnp.float32, -bound, bound)

    kb = 1.0 / float(H) ** 0.5
    # LSTM parameters, stored pre-transposed (x @ W), gate order i,f,g,o.
    wih_f = u(kk[0], (D, G), kb)
    whh_f = u(kk[1], (H, G), kb)
    b_f = u(kk[2], (1, G), kb) + u(kk[3], (1, G), kb)      # b_ih + b_hh
    wih_b = u(kk[4], (D, G), kb)
    # Whh_b is never needed: backward contribution to out[:, -1, :] starts from h0 = 0.
    b_b = u(kk[5], (1, G), kb) + u(kk[6], (1, G), kb)

    k1 = 1.0 / (2.0 * H) ** 0.5
    w1 = u(kk[7], (2 * H, hidden_size), k1)                # pre-transposed
    b1 = u(kk[8], (1, hidden_size), k1)
    k2 = 1.0 / float(hidden_size) ** 0.5
    w2 = u(kk[9], (output_size, hidden_size), k2)          # PyTorch Linear layout
    b2 = u(kk[10], (1, output_size), k2)

    # --- kernel-friendly precomputed layouts ---------------------------------
    # Fused input->hidden weights for both directions, zero-padded to Dp rows.
    wih_all = jnp.zeros((Dp, 2 * G), jnp.float32)
    wih_all = wih_all.at[:D, :G].set(wih_f).at[:D, G:].set(wih_b)

    # One packed slab for all tiny parameters (single DMA):
    #   row 0           : [b_f | b_b]                     (2G lanes)
    #   row 1           : b1 in lanes [0:hid]
    #   rows 2 .. 1+O   : w2 (PyTorch (O, hid) layout) in lanes [0:hid]
    #   row 2+O         : b2 in lanes [0:O]
    assert hidden_size <= 2 * G and O <= 2 * G
    small = jnp.zeros((3 + O, 2 * G), jnp.float32)
    small = small.at[0, :G].set(b_f[0]).at[0, G:].set(b_b[0])
    small = small.at[1, :hidden_size].set(b1[0])
    small = small.at[2:2 + O, :hidden_size].set(w2)
    small = small.at[2 + O, :O].set(b2[0])

    return {"wih_all": wih_all, "whh": whh_f, "w1": w1, "small": small}


if __name__ == "__main__":
    # Small shapes consistent with the module: batch=2, seq_len=8,
    # n_features_in_=4, rnn_size=32, hidden_size=32, n_outputs_=1.
    B, T, D = 2, 8, 4
    RNN, HID, OUT = 32, 32, 1

    key = jax.random.PRNGKey(0)
    kx, kp = jax.random.split(key)
    x = jax.random.normal(kx, (B, T, D), dtype=jnp.float32)
    params = init_params(kp, D, RNN, HID, OUT, T)

    y = bilstm_regressor_forward(x, params)
    y = jax.block_until_ready(y)
    assert y.shape == (B, OUT), y.shape
    print("KERNEL_OK")
</pallas_src>

<mosaic_0001>
module attributes {stable_mosaic.version = 11 : i64} {
  func.func @_bilstm_head_kernel(%arg0: i32, %arg1: memref<8x2x8xf32, #tpu.memory_space<vmem>>, %arg2: memref<8x256xf32, #tpu.memory_space<vmem>>, %arg3: memref<32x128xf32, #tpu.memory_space<vmem>>, %arg4: memref<64x32xf32, #tpu.memory_space<vmem>>, %arg5: memref<4x256xf32, #tpu.memory_space<vmem>>, %arg6: memref<2x1xf32, #tpu.memory_space<vmem>>, %arg7: memref<2x64xf32, #tpu.memory_space<vmem>>) attributes {dimension_semantics = [#tpu.dimension_semantics<parallel>], iteration_bounds = array<i64: 1>, scalar_prefetch = 0 : i64, scratch_operands = 1 : i64, tpu.core_type = #tpu.core_type<tc>, window_params = [{transform_indices = @transform_0, window_bounds = array<i64: 8, 2, 8>}, {pipeline_mode = #tpu.pipeline_mode<synchronous>, transform_indices = @transform_1, window_bounds = array<i64: 8, 256>}, {pipeline_mode = #tpu.pipeline_mode<synchronous>, transform_indices = @transform_2, window_bounds = array<i64: 32, 128>}, {pipeline_mode = #tpu.pipeline_mode<synchronous>, transform_indices = @transform_3, window_bounds = array<i64: 64, 32>}, {pipeline_mode = #tpu.pipeline_mode<synchronous>, transform_indices = @transform_4, window_bounds = array<i64: 4, 256>}, {transform_indices = @transform_5, window_bounds = array<i64: 2, 1>}]} {
    %c0 = arith.constant 0 : index
    %c0_0 = arith.constant 0 : index
    %0 = vector.load %arg2[%c0, %c0_0] : memref<8x256xf32, #tpu.memory_space<vmem>>, vector<8x256xf32>
    %c0_1 = arith.constant 0 : index
    %c0_2 = arith.constant 0 : index
    %1 = vector.load %arg5[%c0_1, %c0_2] : memref<4x256xf32, #tpu.memory_space<vmem>>, vector<1x256xf32>
    %c0_3 = arith.constant 0 : index
    %c0_4 = arith.constant 0 : index
    %c0_5 = arith.constant 0 : index
    %2 = vector.load %arg1[%c0_3, %c0_4, %c0_5] : memref<8x2x8xf32, #tpu.memory_space<vmem>>, vector<1x2x8xf32>
    %3 = vector.shape_cast %2 : vector<1x2x8xf32> to vector<2x8xf32>
    %cst = arith.constant dense<0.000000e+00> : vector<2x256xf32>
    %4 = tpu.matmul %3, %0, %cst {dimension_numbers = #tpu.dot_dimension_numbers<[1], [0], [0], [1], [0, 0, 1, 1], [], []>} : vector<2x8xf32>, vector<8x256xf32>, vector<2x256xf32> -> vector<2x256xf32>
    %5 = vector.broadcast %1 : vector<1x256xf32> to vector<2x256xf32>
    %6 = arith.addf %4, %5 : vector<2x256xf32>
    %c1 = arith.constant 1 : index
    %c0_6 = arith.constant 0 : index
    %c0_7 = arith.constant 0 : index
    %7 = vector.load %arg1[%c1, %c0_6, %c0_7] : memref<8x2x8xf32, #tpu.memory_space<vmem>>, vector<1x2x8xf32>
    %8 = vector.shape_cast %7 : vector<1x2x8xf32> to vector<2x8xf32>
    %cst_8 = arith.constant dense<0.000000e+00> : vector<2x256xf32>
    %9 = tpu.matmul %8, %0, %cst_8 {dimension_numbers = #tpu.dot_dimension_numbers<[1], [0], [0], [1], [0, 0, 1, 1], [], []>} : vector<2x8xf32>, vector<8x256xf32>, vector<2x256xf32> -> vector<2x256xf32>
    %10 = vector.broadcast %1 : vector<1x256xf32> to vector<2x256xf32>
    %11 = arith.addf %9, %10 : vector<2x256xf32>
    %c2 = arith.constant 2 : index
    %c0_9 = arith.constant 0 : index
    %c0_10 = arith.constant 0 : index
    %12 = vector.load %arg1[%c2, %c0_9, %c0_10] : memref<8x2x8xf32, #tpu.memory_space<vmem>>, vector<1x2x8xf32>
    %13 = vector.shape_cast %12 : vector<1x2x8xf32> to vector<2x8xf32>
    %cst_11 = arith.constant dense<0.000000e+00> : vector<2x256xf32>
    %14 = tpu.matmul %13, %0, %cst_11 {dimension_numbers = #tpu.dot_dimension_numbers<[1], [0], [0], [1], [0, 0, 1, 1], [], []>} : vector<2x8xf32>, vector<8x256xf32>, vector<2x256xf32> -> vector<2x256xf32>
    %15 = vector.broadcast %1 : vector<1x256xf32> to vector<2x256xf32>
    %16 = arith.addf %14, %15 : vector<2x256xf32>
    %c3 = arith.constant 3 : index
    %c0_12 = arith.constant 0 : index
    %c0_13 = arith.constant 0 : index
    %17 = vector.load %arg1[%c3, %c0_12, %c0_13] : memref<8x2x8xf32, #tpu.memory_space<vmem>>, vector<1x2x8xf32>
    %18 = vector.shape_cast %17 : vector<1x2x8xf32> to vector<2x8xf32>
    %cst_14 = arith.constant dense<0.000000e+00> : vector<2x256xf32>
    %19 = tpu.matmul %18, %0, %cst_14 {dimension_numbers = #tpu.dot_dimension_numbers<[1], [0], [0], [1], [0, 0, 1, 1], [], []>} : vector<2x8xf32>, vector<8x256xf32>, vector<2x256xf32> -> vector<2x256xf32>
    %20 = vector.broadcast %1 : vector<1x256xf32> to vector<2x256xf32>
    %21 = arith.addf %19, %20 : vector<2x256xf32>
    %c4 = arith.constant 4 : index
    %c0_15 = arith.constant 0 : index
    %c0_16 = arith.constant 0 : index
    %22 = vector.load %arg1[%c4, %c0_15, %c0_16] : memref<8x2x8xf32, #tpu.memory_space<vmem>>, vector<1x2x8xf32>
    %23 = vector.shape_cast %22 : vector<1x2x8xf32> to vector<2x8xf32>
    %cst_17 = arith.constant dense<0.000000e+00> : vector<2x256xf32>
    %24 = tpu.matmul %23, %0, %cst_17 {dimension_numbers = #tpu.dot_dimension_numbers<[1], [0], [0], [1], [0, 0, 1, 1], [], []>} : vector<2x8xf32>, vector<8x256xf32>, vector<2x256xf32> -> vector<2x256xf32>
    %25 = vector.broadcast %1 : vector<1x256xf32> to vector<2x256xf32>
    %26 = arith.addf %24, %25 : vector<2x256xf32>
    %c5 = arith.constant 5 : index
    %c0_18 = arith.constant 0 : index
    %c0_19 = arith.constant 0 : index
    %27 = vector.load %arg1[%c5, %c0_18, %c0_19] : memref<8x2x8xf32, #tpu.memory_space<vmem>>, vector<1x2x8xf32>
    %28 = vector.shape_cast %27 : vector<1x2x8xf32> to vector<2x8xf32>
    %cst_20 = arith.constant dense<0.000000e+00> : vector<2x256xf32>
    %29 = tpu.matmul %28, %0, %cst_20 {dimension_numbers = #tpu.dot_dimension_numbers<[1], [0], [0], [1], [0, 0, 1, 1], [], []>} : vector<2x8xf32>, vector<8x256xf32>, vector<2x256xf32> -> vector<2x256xf32>
    %30 = vector.broadcast %1 : vector<1x256xf32> to vector<2x256xf32>
    %31 = arith.addf %29, %30 : vector<2x256xf32>
    %c6 = arith.constant 6 : index
    %c0_21 = arith.constant 0 : index
    %c0_22 = arith.constant 0 : index
    %32 = vector.load %arg1[%c6, %c0_21, %c0_22] : memref<8x2x8xf32, #tpu.memory_space<vmem>>, vector<1x2x8xf32>
    %33 = vector.shape_cast %32 : vector<1x2x8xf32> to vector<2x8xf32>
    %cst_23 = arith.constant dense<0.000000e+00> : vector<2x256xf32>
    %34 = tpu.matmul %33, %0, %cst_23 {dimension_numbers = #tpu.dot_dimension_numbers<[1], [0], [0], [1], [0, 0, 1, 1], [], []>} : vector<2x8xf32>, vector<8x256xf32>, vector<2x256xf32> -> vector<2x256xf32>
    %35 = vector.broadcast %1 : vector<1x256xf32> to vector<2x256xf32>
    %36 = arith.addf %34, %35 : vector<2x256xf32>
    %c7 = arith.constant 7 : index
    %c0_24 = arith.constant 0 : index
    %c0_25 = arith.constant 0 : index
    %37 = vector.load %arg1[%c7, %c0_24, %c0_25] : memref<8x2x8xf32, #tpu.memory_space<vmem>>, vector<1x2x8xf32>
    %38 = vector.shape_cast %37 : vector<1x2x8xf32> to vector<2x8xf32>
    %cst_26 = arith.constant dense<0.000000e+00> : vector<2x256xf32>
    %39 = tpu.matmul %38, %0, %cst_26 {dimension_numbers = #tpu.dot_dimension_numbers<[1], [0], [0], [1], [0, 0, 1, 1], [], []>} : vector<2x8xf32>, vector<8x256xf32>, vector<2x256xf32> -> vector<2x256xf32>
    %40 = vector.broadcast %1 : vector<1x256xf32> to vector<2x256xf32>
    %41 = arith.addf %39, %40 : vector<2x256xf32>
    %c0_27 = arith.constant 0 : index
    %c0_28 = arith.constant 0 : index
    %42 = vector.load %arg3[%c0_27, %c0_28] : memref<32x128xf32, #tpu.memory_space<vmem>>, vector<32x128xf32>
    %cst_29 = arith.constant 0.000000e+00 : f32
    %43 = vector.broadcast %cst_29 : f32 to vector<2x32xf32>
    %cst_30 = arith.constant 0.000000e+00 : f32
    %44 = vector.broadcast %cst_30 : f32 to vector<2x32xf32>
    %45 = vector.extract_strided_slice %6 {offsets = [0, 0], sizes = [2, 128], strides = [1, 1]} : vector<2x256xf32> to vector<2x128xf32>
    %cst_31 = arith.constant dense<0.000000e+00> : vector<2x128xf32>
    %46 = tpu.matmul %43, %42, %cst_31 {dimension_numbers = #tpu.dot_dimension_numbers<[1], [0], [0], [1], [0, 0, 1, 1], [], []>} : vector<2x32xf32>, vector<32x128xf32>, vector<2x128xf32> -> vector<2x128xf32>
    %47 = arith.addf %45, %46 : vector<2x128xf32>
    %48 = arith.negf %47 : vector<2x128xf32>
    %49 = math.exp %48 : vector<2x128xf32>
    %cst_32 = arith.constant 1.000000e+00 : f32
    %50 = vector.broadcast %cst_32 : f32 to vector<2x128xf32>
    %51 = arith.addf %50, %49 : vector<2x128xf32>
    %52 = arith.divf %50, %51 : vector<2x128xf32>
    %53 = math.tanh %47 : vector<2x128xf32>
    %54 = vector.extract_strided_slice %52 {offsets = [0, 0], sizes = [2, 32], strides = [1, 1]} : vector<2x128xf32> to vector<2x32xf32>
    %55 = vector.extract_strided_slice %52 {offsets = [0, 32], sizes = [2, 32], strides = [1, 1]} : vector<2x128xf32> to vector<2x32xf32>
    %56 = vector.extract_strided_slice %53 {offsets = [0, 64], sizes = [2, 32], strides = [1, 1]} : vector<2x128xf32> to vector<2x32xf32>
    %57 = vector.extract_strided_slice %52 {offsets = [0, 96], sizes = [2, 32], strides = [1, 1]} : vector<2x128xf32> to vector<2x32xf32>
    %58 = arith.mulf %55, %44 : vector<2x32xf32>
    %59 = arith.mulf %54, %56 : vector<2x32xf32>
    %60 = arith.addf %58, %59 : vector<2x32xf32>
    %61 = math.tanh %60 : vector<2x32xf32>
    %62 = arith.mulf %57, %61 : vector<2x32xf32>
    %63 = vector.extract_strided_slice %11 {offsets = [0, 0], sizes = [2, 128], strides = [1, 1]} : vector<2x256xf32> to vector<2x128xf32>
    %cst_33 = arith.constant dense<0.000000e+00> : vector<2x128xf32>
    %64 = tpu.matmul %62, %42, %cst_33 {dimension_numbers = #tpu.dot_dimension_numbers<[1], [0], [0], [1], [0, 0, 1, 1], [], []>} : vector<2x32xf32>, vector<32x128xf32>, vector<2x128xf32> -> vector<2x128xf32>
    %65 = arith.addf %63, %64 : vector<2x128xf32>
    %66 = arith.negf %65 : vector<2x128xf32>
    %67 = math.exp %66 : vector<2x128xf32>
    %cst_34 = arith.constant 1.000000e+00 : f32
    %68 = vector.broadcast %cst_34 : f32 to vector<2x128xf32>
    %69 = arith.addf %68, %67 : vector<2x128xf32>
    %70 = arith.divf %68, %69 : vector<2x128xf32>
    %71 = math.tanh %65 : vector<2x128xf32>
    %72 = vector.extract_strided_slice %70 {offsets = [0, 0], sizes = [2, 32], strides = [1, 1]} : vector<2x128xf32> to vector<2x32xf32>
    %73 = vector.extract_strided_slice %70 {offsets = [0, 32], sizes = [2, 32], strides = [1, 1]} : vector<2x128xf32> to vector<2x32xf32>
    %74 = vector.extract_strided_slice %71 {offsets = [0, 64], sizes = [2, 32], strides = [1, 1]} : vector<2x128xf32> to vector<2x32xf32>
    %75 = vector.extract_strided_slice %70 {offsets = [0, 96], sizes = [2, 32], strides = [1, 1]} : vector<2x128xf32> to vector<2x32xf32>
    %76 = arith.mulf %73, %60 : vector<2x32xf32>
    %77 = arith.mulf %72, %74 : vector<2x32xf32>
    %78 = arith.addf %76, %77 : vector<2x32xf32>
    %79 = math.tanh %78 : vector<2x32xf32>
    %80 = arith.mulf %75, %79 : vector<2x32xf32>
    %81 = vector.extract_strided_slice %16 {offsets = [0, 0], sizes = [2, 128], strides = [1, 1]} : vector<2x256xf32> to vector<2x128xf32>
    %cst_35 = arith.constant dense<0.000000e+00> : vector<2x128xf32>
    %82 = tpu.matmul %80, %42, %cst_35 {dimension_numbers = #tpu.dot_dimension_numbers<[1], [0], [0], [1], [0, 0, 1, 1], [], []>} : vector<2x32xf32>, vector<32x128xf32>, vector<2x128xf32> -> vector<2x128xf32>
    %83 = arith.addf %81, %82 : vector<2x128xf32>
    %84 = arith.negf %83 : vector<2x128xf32>
    %85 = math.exp %84 : vector<2x128xf32>
    %cst_36 = arith.constant 1.000000e+00 : f32
    %86 = vector.broadcast %cst_36 : f32 to vector<2x128xf32>
    %87 = arith.addf %86, %85 : vector<2x128xf32>
    %88 = arith.divf %86, %87 : vector<2x128xf32>
    %89 = math.tanh %83 : vector<2x128xf32>
    %90 = vector.extract_strided_slice %88 {offsets = [0, 0], sizes = [2, 32], strides = [1, 1]} : vector<2x128xf32> to vector<2x32xf32>
    %91 = vector.extract_strided_slice %88 {offsets = [0, 32], sizes = [2, 32], strides = [1, 1]} : vector<2x128xf32> to vector<2x32xf32>
    %92 = vector.extract_strided_slice %89 {offsets = [0, 64], sizes = [2, 32], strides = [1, 1]} : vector<2x128xf32> to vector<2x32xf32>
    %93 = vector.extract_strided_slice %88 {offsets = [0, 96], sizes = [2, 32], strides = [1, 1]} : vector<2x128xf32> to vector<2x32xf32>
    %94 = arith.mulf %91, %78 : vector<2x32xf32>
    %95 = arith.mulf %90, %92 : vector<2x32xf32>
    %96 = arith.addf %94, %95 : vector<2x32xf32>
    %97 = math.tanh %96 : vector<2x32xf32>
    %98 = arith.mulf %93, %97 : vector<2x32xf32>
    %99 = vector.extract_strided_slice %21 {offsets = [0, 0], sizes = [2, 128], strides = [1, 1]} : vector<2x256xf32> to vector<2x128xf32>
    %cst_37 = arith.constant dense<0.000000e+00> : vector<2x128xf32>
    %100 = tpu.matmul %98, %42, %cst_37 {dimension_numbers = #tpu.dot_dimension_numbers<[1], [0], [0], [1], [0, 0, 1, 1], [], []>} : vector<2x32xf32>, vector<32x128xf32>, vector<2x128xf32> -> vector<2x128xf32>
    %101 = arith.addf %99, %100 : vector<2x128xf32>
    %102 = arith.negf %101 : vector<2x128xf32>
    %103 = math.exp %102 : vector<2x128xf32>
    %cst_38 = arith.constant 1.000000e+00 : f32
    %104 = vector.broadcast %cst_38 : f32 to vector<2x128xf32>
    %105 = arith.addf %104, %103 : vector<2x128xf32>
    %106 = arith.divf %104, %105 : vector<2x128xf32>
    %107 = math.tanh %101 : vector<2x128xf32>
    %108 = vector.extract_strided_slice %106 {offsets = [0, 0], sizes = [2, 32], strides = [1, 1]} : vector<2x128xf32> to vector<2x32xf32>
    %109 = vector.extract_strided_slice %106 {offsets = [0, 32], sizes = [2, 32], strides = [1, 1]} : vector<2x128xf32> to vector<2x32xf32>
    %110 = vector.extract_strided_slice %107 {offsets = [0, 64], sizes = [2, 32], strides = [1, 1]} : vector<2x128xf32> to vector<2x32xf32>
    %111 = vector.extract_strided_slice %106 {offsets = [0, 96], sizes = [2, 32], strides = [1, 1]} : vector<2x128xf32> to vector<2x32xf32>
    %112 = arith.mulf %109, %96 : vector<2x32xf32>
    %113 = arith.mulf %108, %110 : vector<2x32xf32>
    %114 = arith.addf %112, %113 : vector<2x32xf32>
    %115 = math.tanh %114 : vector<2x32xf32>
    %116 = arith.mulf %111, %115 : vector<2x32xf32>
    %117 = vector.extract_strided_slice %26 {offsets = [0, 0], sizes = [2, 128], strides = [1, 1]} : vector<2x256xf32> to vector<2x128xf32>
    %cst_39 = arith.constant dense<0.000000e+00> : vector<2x128xf32>
    %118 = tpu.matmul %116, %42, %cst_39 {dimension_numbers = #tpu.dot_dimension_numbers<[1], [0], [0], [1], [0, 0, 1, 1], [], []>} : vector<2x32xf32>, vector<32x128xf32>, vector<2x128xf32> -> vector<2x128xf32>
    %119 = arith.addf %117, %118 : vector<2x128xf32>
    %120 = arith.negf %119 : vector<2x128xf32>
    %121 = math.exp %120 : vector<2x128xf32>
    %cst_40 = arith.constant 1.000000e+00 : f32
    %122 = vector.broadcast %cst_40 : f32 to vector<2x128xf32>
    %123 = arith.addf %122, %121 : vector<2x128xf32>
    %124 = arith.divf %122, %123 : vector<2x128xf32>
    %125 = math.tanh %119 : vector<2x128xf32>
    %126 = vector.extract_strided_slice %124 {offsets = [0, 0], sizes = [2, 32], strides = [1, 1]} : vector<2x128xf32> to vector<2x32xf32>
    %127 = vector.extract_strided_slice %124 {offsets = [0, 32], sizes = [2, 32], strides = [1, 1]} : vector<2x128xf32> to vector<2x32xf32>
    %128 = vector.extract_strided_slice %125 {offsets = [0, 64], sizes = [2, 32], strides = [1, 1]} : vector<2x128xf32> to vector<2x32xf32>
    %129 = vector.extract_strided_slice %124 {offsets = [0, 96], sizes = [2, 32], strides = [1, 1]} : vector<2x128xf32> to vector<2x32xf32>
    %130 = arith.mulf %127, %114 : vector<2x32xf32>
    %131 = arith.mulf %126, %128 : vector<2x32xf32>
    %132 = arith.addf %130, %131 : vector<2x32xf32>
    %133 = math.tanh %132 : vector<2x32xf32>
    %134 = arith.mulf %129, %133 : vector<2x32xf32>
    %135 = vector.extract_strided_slice %31 {offsets = [0, 0], sizes = [2, 128], strides = [1, 1]} : vector<2x256xf32> to vector<2x128xf32>
    %cst_41 = arith.constant dense<0.000000e+00> : vector<2x128xf32>
    %136 = tpu.matmul %134, %42, %cst_41 {dimension_numbers = #tpu.dot_dimension_numbers<[1], [0], [0], [1], [0, 0, 1, 1], [], []>} : vector<2x32xf32>, vector<32x128xf32>, vector<2x128xf32> -> vector<2x128xf32>
    %137 = arith.addf %135, %136 : vector<2x128xf32>
    %138 = arith.negf %137 : vector<2x128xf32>
    %139 = math.exp %138 : vector<2x128xf32>
    %cst_42 = arith.constant 1.000000e+00 : f32
    %140 = vector.broadcast %cst_42 : f32 to vector<2x128xf32>
    %141 = arith.addf %140, %139 : vector<2x128xf32>
    %142 = arith.divf %140, %141 : vector<2x128xf32>
    %143 = math.tanh %137 : vector<2x128xf32>
    %144 = vector.extract_strided_slice %142 {offsets = [0, 0], sizes = [2, 32], strides = [1, 1]} : vector<2x128xf32> to vector<2x32xf32>
    %145 = vector.extract_strided_slice %142 {offsets = [0, 32], sizes = [2, 32], strides = [1, 1]} : vector<2x128xf32> to vector<2x32xf32>
    %146 = vector.extract_strided_slice %143 {offsets = [0, 64], sizes = [2, 32], strides = [1, 1]} : vector<2x128xf32> to vector<2x32xf32>
    %147 = vector.extract_strided_slice %142 {offsets = [0, 96], sizes = [2, 32], strides = [1, 1]} : vector<2x128xf32> to vector<2x32xf32>
    %148 = arith.mulf %145, %132 : vector<2x32xf32>
    %149 = arith.mulf %144, %146 : vector<2x32xf32>
    %150 = arith.addf %148, %149 : vector<2x32xf32>
    %151 = math.tanh %150 : vector<2x32xf32>
    %152 = arith.mulf %147, %151 : vector<2x32xf32>
    %153 = vector.extract_strided_slice %36 {offsets = [0, 0], sizes = [2, 128], strides = [1, 1]} : vector<2x256xf32> to vector<2x128xf32>
    %cst_43 = arith.constant dense<0.000000e+00> : vector<2x128xf32>
    %154 = tpu.matmul %152, %42, %cst_43 {dimension_numbers = #tpu.dot_dimension_numbers<[1], [0], [0], [1], [0, 0, 1, 1], [], []>} : vector<2x32xf32>, vector<32x128xf32>, vector<2x128xf32> -> vector<2x128xf32>
    %155 = arith.addf %153, %154 : vector<2x128xf32>
    %156 = arith.negf %155 : vector<2x128xf32>
    %157 = math.exp %156 : vector<2x128xf32>
    %cst_44 = arith.constant 1.000000e+00 : f32
    %158 = vector.broadcast %cst_44 : f32 to vector<2x128xf32>
    %159 = arith.addf %158, %157 : vector<2x128xf32>
    %160 = arith.divf %158, %159 : vector<2x128xf32>
    %161 = math.tanh %155 : vector<2x128xf32>
    %162 = vector.extract_strided_slice %160 {offsets = [0, 0], sizes = [2, 32], strides = [1, 1]} : vector<2x128xf32> to vector<2x32xf32>
    %163 = vector.extract_strided_slice %160 {offsets = [0, 32], sizes = [2, 32], strides = [1, 1]} : vector<2x128xf32> to vector<2x32xf32>
    %164 = vector.extract_strided_slice %161 {offsets = [0, 64], sizes = [2, 32], strides = [1, 1]} : vector<2x128xf32> to vector<2x32xf32>
    %165 = vector.extract_strided_slice %160 {offsets = [0, 96], sizes = [2, 32], strides = [1, 1]} : vector<2x128xf32> to vector<2x32xf32>
    %166 = arith.mulf %163, %150 : vector<2x32xf32>
    %167 = arith.mulf %162, %164 : vector<2x32xf32>
    %168 = arith.addf %166, %167 : vector<2x32xf32>
    %169 = math.tanh %168 : vector<2x32xf32>
    %170 = arith.mulf %165, %169 : vector<2x32xf32>
    %171 = vector.extract_strided_slice %41 {offsets = [0, 0], sizes = [2, 128], strides = [1, 1]} : vector<2x256xf32> to vector<2x128xf32>
    %cst_45 = arith.constant dense<0.000000e+00> : vector<2x128xf32>
    %172 = tpu.matmul %170, %42, %cst_45 {dimension_numbers = #tpu.dot_dimension_numbers<[1], [0], [0], [1], [0, 0, 1, 1], [], []>} : vector<2x32xf32>, vector<32x128xf32>, vector<2x128xf32> -> vector<2x128xf32>
    %173 = arith.addf %171, %172 : vector<2x128xf32>
    %174 = arith.negf %173 : vector<2x128xf32>
    %175 = math.exp %174 : vector<2x128xf32>
    %cst_46 = arith.constant 1.000000e+00 : f32
    %176 = vector.broadcast %cst_46 : f32 to vector<2x128xf32>
    %177 = arith.addf %176, %175 : vector<2x128xf32>
    %178 = arith.divf %176, %177 : vector<2x128xf32>
    %179 = math.tanh %173 : vector<2x128xf32>
    %180 = vector.extract_strided_slice %178 {offsets = [0, 0], sizes = [2, 32], strides = [1, 1]} : vector<2x128xf32> to vector<2x32xf32>
    %181 = vector.extract_strided_slice %178 {offsets = [0, 32], sizes = [2, 32], strides = [1, 1]} : vector<2x128xf32> to vector<2x32xf32>
    %182 = vector.extract_strided_slice %179 {offsets = [0, 64], sizes = [2, 32], strides = [1, 1]} : vector<2x128xf32> to vector<2x32xf32>
    %183 = vector.extract_strided_slice %178 {offsets = [0, 96], sizes = [2, 32], strides = [1, 1]} : vector<2x128xf32> to vector<2x32xf32>
    %184 = arith.mulf %181, %168 : vector<2x32xf32>
    %185 = arith.mulf %180, %182 : vector<2x32xf32>
    %186 = arith.addf %184, %185 : vector<2x32xf32>
    %187 = math.tanh %186 : vector<2x32xf32>
    %188 = arith.mulf %183, %187 : vector<2x32xf32>
    %189 = vector.extract_strided_slice %41 {offsets = [0, 128], sizes = [2, 128], strides = [1, 1]} : vector<2x256xf32> to vector<2x128xf32>
    %190 = arith.negf %189 : vector<2x128xf32>
    %191 = math.exp %190 : vector<2x128xf32>
    %cst_47 = arith.constant 1.000000e+00 : f32
    %192 = vector.broadcast %cst_47 : f32 to vector<2x128xf32>
    %193 = arith.addf %192, %191 : vector<2x128xf32>
    %194 = arith.divf %192, %193 : vector<2x128xf32>
    %195 = math.tanh %189 : vector<2x128xf32>
    %196 = vector.extract_strided_slice %194 {offsets = [0, 0], sizes = [2, 32], strides = [1, 1]} : vector<2x128xf32> to vector<2x32xf32>
    %197 = vector.extract_strided_slice %195 {offsets = [0, 64], sizes = [2, 32], strides = [1, 1]} : vector<2x128xf32> to vector<2x32xf32>
    %198 = arith.mulf %196, %197 : vector<2x32xf32>
    %199 = vector.extract_strided_slice %194 {offsets = [0, 96], sizes = [2, 32], strides = [1, 1]} : vector<2x128xf32> to vector<2x32xf32>
    %200 = math.tanh %198 : vector<2x32xf32>
    %201 = arith.mulf %199, %200 : vector<2x32xf32>
    %c0_48 = arith.constant 0 : index
    %c0_49 = arith.constant 0 : index
    %202 = vector.load %arg7[%c0_48, %c0_49] : memref<2x64xf32, #tpu.memory_space<vmem>>, vector<2x32xf32>
    tpu.vector_store %arg7[%c0_48, %c0_49], %188 {strides = array<i32>} : memref<2x64xf32, #tpu.memory_space<vmem>>, vector<2x32xf32>,
    %c0_50 = arith.constant 0 : index
    %c32 = arith.constant 32 : index
    %203 = vector.load %arg7[%c0_50, %c32] : memref<2x64xf32, #tpu.memory_space<vmem>>, vector<2x32xf32>
    tpu.vector_store %arg7[%c0_50, %c32], %201 {strides = array<i32>} : memref<2x64xf32, #tpu.memory_space<vmem>>, vector<2x32xf32>,
    %c1_51 = arith.constant 1 : index
    %c0_52 = arith.constant 0 : index
    %204 = vector.load %arg5[%c1_51, %c0_52] : memref<4x256xf32, #tpu.memory_space<vmem>>, vector<1x32xf32>
    %c0_53 = arith.constant 0 : index
    %c0_54 = arith.constant 0 : index
    %205 = vector.load %arg7[%c0_53, %c0_54] : memref<2x64xf32, #tpu.memory_space<vmem>>, vector<2x64xf32>
    %c0_55 = arith.constant 0 : index
    %c0_56 = arith.constant 0 : index
    %206 = vector.load %arg4[%c0_55, %c0_56] : memref<64x32xf32, #tpu.memory_space<vmem>>, vector<64x32xf32>
    %cst_57 = arith.constant dense<0.000000e+00> : vector<2x32xf32>
    %207 = tpu.matmul %205, %206, %cst_57 {dimension_numbers = #tpu.dot_dimension_numbers<[1], [0], [0], [1], [0, 0, 1, 1], [], []>} : vector<2x64xf32>, vector<64x32xf32>, vector<2x32xf32> -> vector<2x32xf32>
    %208 = vector.broadcast %204 : vector<1x32xf32> to vector<2x32xf32>
    %209 = arith.addf %207, %208 : vector<2x32xf32>
    %cst_58 = arith.constant 0.000000e+00 : f32
    %210 = vector.broadcast %cst_58 : f32 to vector<2x32xf32>
    %211 = arith.maximumf %209, %210 : vector<2x32xf32>
    %c2_59 = arith.constant 2 : index
    %c0_60 = arith.constant 0 : index
    %212 = vector.load %arg5[%c2_59, %c0_60] : memref<4x256xf32, #tpu.memory_space<vmem>>, vector<1x32xf32>
    %c3_61 = arith.constant 3 : index
    %c0_62 = arith.constant 0 : index
    %213 = vector.load %arg5[%c3_61, %c0_62] : memref<4x256xf32, #tpu.memory_space<vmem>>, vector<1x1xf32>
    %214 = vector.broadcast %212 : vector<1x32xf32> to vector<2x32xf32>
    %215 = arith.mulf %211, %214 : vector<2x32xf32>
    %cst_63 = arith.constant dense<0.000000e+00> : vector<2xf32>
    %216 = vector.multi_reduction <add>, %215, %cst_63 [1] : vector<2x32xf32> to vector<2xf32>
    %217 = vector.shape_cast %216 : vector<2xf32> to vector<2x1xf32>
    %218 = vector.broadcast %213 : vector<1x1xf32> to vector<2x1xf32>
    %219 = arith.addf %217, %218 : vector<2x1xf32>
    %c0_64 = arith.constant 0 : index
    %c0_65 = arith.constant 0 : index
    %220 = vector.load %arg6[%c0_64, %c0_65] : memref<2x1xf32, #tpu.memory_space<vmem>>, vector<2x1xf32>
    tpu.vector_store %arg6[%c0_64, %c0_65], %219 {strides = array<i32>} : memref<2x1xf32, #tpu.memory_space<vmem>>, vector<2x1xf32>,
    return
  }
  func.func @transform_0(%arg0: i32) -> (i32, i32, i32) {
    %c0_i32 = arith.constant 0 : i32
    %c0_i32_0 = arith.constant 0 : i32
    %c0_i32_1 = arith.constant 0 : i32
    return %c0_i32, %arg0, %c0_i32_0 : i32, i32, i32
  }
  func.func @transform_1(%arg0: i32) -> (i32, i32) {
    %c0_i32 = arith.constant 0 : i32
    %c0_i32_0 = arith.constant 0 : i32
    %c0_i32_1 = arith.constant 0 : i32
    return %c0_i32, %c0_i32_0 : i32, i32
  }
  func.func @transform_2(%arg0: i32) -> (i32, i32) {
    %c0_i32 = arith.constant 0 : i32
    %c0_i32_0 = arith.constant 0 : i32
    %c0_i32_1 = arith.constant 0 : i32
    return %c0_i32, %c0_i32_0 : i32, i32
  }
  func.func @transform_3(%arg0: i32) -> (i32, i32) {
    %c0_i32 = arith.constant 0 : i32
    %c0_i32_0 = arith.constant 0 : i32
    %c0_i32_1 = arith.constant 0 : i32
    return %c0_i32, %c0_i32_0 : i32, i32
  }
  func.func @transform_4(%arg0: i32) -> (i32, i32) {
    %c0_i32 = arith.constant 0 : i32
    %c0_i32_0 = arith.constant 0 : i32
    %c0_i32_1 = arith.constant 0 : i32
    return %c0_i32, %c0_i32_0 : i32, i32
  }
  func.func @transform_5(%arg0: i32) -> (i32, i32) {
    %c0_i32 = arith.constant 0 : i32
    %c0_i32_0 = arith.constant 0 : i32
    return %arg0, %c0_i32 : i32, i32
  }
}

</mosaic_0001>

<bundles_post_ra>
// kernel: bilstm_regressor_forward.1
= control target key start
LH: loop header
LB: loop body
LE: loop exit
PB: predicated region body
PF: predicated region fallthrough
CT: control target
= control target key end

     0   :  { %v1927_v2 = vmov 0.0   ;;  %vm35_vm0 = vcmask 64512   ;;  %v1928_v11 = vmov 0.0|0.0   ;;  %vm1929_vm1 = vmmov 0   ;;  %s1930_s15 = smov 64   ;;  %s1931_s16 = smov 32   ;;  %s2206_s1 = inlined_call_operand.vmem [shape: f32[8,256], index: 1, kind: input, shape index: {}]   ;;  %s2207_s0 = inlined_call_operand.vmem [shape: f32[8,2,8], index: 0, kind: input, shape index: {}]   ;;  %s2208_s2 = inlined_call_operand.vmem [shape: f32[32,128], index: 2, kind: input, shape index: {}]   ;;  %s2209_s4 = inlined_call_operand.vmem [shape: f32[4,256], index: 4, kind: input, shape index: {}]   ;;  %s2210_s3 = inlined_call_operand.vmem [shape: f32[64,32], index: 3, kind: input, shape index: {}]   ;;  %s2211_s5 = inlined_call_operand.vmem [shape: f32[2,1], index: 5, kind: output, shape index: {}]  }
   0x1   :  { %v1966_v0 = vld [vmem:[%s2206_s1 + $0x8] sm:$0xff]  ;;  %v1971_v1 = vld [vmem:[%s2206_s1] sm:$0xff]  ;;  %178 = vmatprep.mubr.f32.mxu1 %v1927_v2  ;;  %103 = vmatprep.mubr.f32.mxu0 %v1927_v2  ;;  %v637_v12 = vld [vmem:[%s2208_s2 + $0x10] sm:$0xff]  ;;  %v25_v16 = vlaneseq  ;;  %vm639_vm2 = vcmask 261120   ;;  %vm1460_vm3 = vcmask 254976   ;;  %vm1466_vm4 = vcmask 517376  }
   0x2   :  { %v1579_v3 = vld [vmem:[%s2207_s0 + $0x2] sm:$0x3]  ;;  %114 = vmatprep.subr.mxu1 %v1966_v0  ;;  %39 = vmatprep.subr.mxu0 %v1966_v0  ;;  %v23_v4 = vld [vmem:[%s2207_s0] sm:$0x3]  ;;  %v1583_v5 = vld [vmem:[%s2207_s0 + $0x6] sm:$0x3] }
   0x3   :  { %115 = vmatpush1.msra.mxu1 %v1971_v1  ;;  %40 = vmatpush1.msra.mxu0 %v1971_v1  ;;  %v1587_v6 = vld [vmem:[%s2207_s0 + $0xa] sm:$0x3]  ;;  %v635_v7 = vld [vmem:[%s2208_s2] sm:$0xff]  ;;  %v1591_v9 = vld [vmem:[%s2207_s0 + $0xe] sm:$0x3]  ;;  %v2042_v18 = vshrl.u32 %v25_v16, 7 }
   0x4   :  { %1580 = vmatmul.mubr.msk.f32.vlgmr.msra.gmra.mrb[0].mxu1 %vm35_vm0, %v1579_v3  ;;  %264 = vmatprep.subr.mxu1 %v1966_v0  ;;  %v636_v8 = vld [vmem:[%s2208_s2 + $0x8] sm:$0xff]  ;;  %v638_v13 = vld [vmem:[%s2208_s2 + $0x18] sm:$0xff]  ;;  %v2048_v20 = vld [vmem:[%s2209_s4] ss:$4 sm:$0x3]  ;;  %vm1482_vm5 = vcmask 523264  }
   0x5   :  { %265 = vmatpush1.msra.mxu1 %v1971_v1  ;;  %328 = vmatprep.mubr.f32.mxu1 %v1927_v2  ;;  %v2017_v10 = vpack.c.bf16 %v636_v8, %v635_v7  ;;  %v2028_v14 = vpack.c.bf16 %v638_v13, %v637_v12  ;;  %v27_v19 = vsub.s32 0, %v2042_v18  ;;  %v1581_v55 = vld [vmem:[%s2207_s0 + $0x4] sm:$0x3]  ;;  %v1585_v56 = vld [vmem:[%s2207_s0 + $0x8] sm:$0x3]  ;;  %vm1572_vm6 = vcmask 1024  }
   0x6   :  { %414 = vmatprep.subr.mxu1 %v1966_v0  ;;  %1578 = vmatmul.mubr.msk.f32.vlgmr.msra.gmra.mrb[0].mxu0 %vm35_vm0, %v23_v4  ;;  %v1589_v57 = vld [vmem:[%s2207_s0 + $0xc] sm:$0x3]  ;;  %s1932_s0 = smov 96  }
   0x7   :  { %189 = vmatprep.subr.mxu0 %v1966_v0  ;;  %253 = vmatprep.mubr.f32.mxu0 %v1927_v2  ;;  %v2055_v23 = vrot.slane %v2048_v20, %v27_v19 }
   0x8   :  { %1584 = vmatmul.mubr.msk.f32.vlgmr.msra.gmra.mrb[2].mxu1 %vm35_vm0, %v1583_v5  ;;  %190 = vmatpush1.msra.mxu0 %v1971_v1 }
   0x9   :  { %415 = vmatpush1.msra.mxu1 %v1971_v1  ;;  %478 = vmatprep.mubr.f32.mxu1 %v1927_v2 }
   0xa   :  { %564 = vmatprep.subr.mxu1 %v1966_v0  ;;  %339 = vmatprep.subr.mxu0 %v1966_v0 }
   0xb   :  { %1582 = vmatmul.mubr.msk.f32.vlgmr.msra.gmra.mrb[2].mxu0 %vm35_vm0, %v1581_v55 }
   0xc   :  { %1588 = vmatmul.mubr.msk.f32.vlgmr.msra.gmra.mrb[4].mxu1 %vm35_vm0, %v1587_v6  ;;  %340 = vmatpush1.msra.mxu0 %v1971_v1 }
   0xd   :  { %565 = vmatpush1.msra.mxu1 %v1971_v1  ;;  %628 = vmatprep.mubr.f32.mxu1 %v1927_v2 }
   0xe   :  { %1769 = vmatprep.subr.bf16.mxu1 %v1928_v11  ;;  %403 = vmatprep.mubr.f32.mxu0 %v1927_v2 }
   0xf   :  { %489 = vmatprep.subr.mxu0 %v1966_v0  ;;  %1586 = vmatmul.mubr.msk.f32.vlgmr.msra.gmra.mrb[4].mxu0 %vm35_vm0, %v1585_v56 }
  0x10   :  { %1592 = vmatmul.mubr.msk.f32.vlgmr.msra.gmra.mrb[6].mxu1 %vm35_vm0, %v1591_v9  ;;  %490 = vmatpush1.msra.mxu0 %v1971_v1 }
  0x11   :  { %1771 = vmatpush3.bf16.msra.mxu1 %v2017_v10  ;;  %1670 = vmatprep.mubr.msk.f32.mxu1 %vm1929_vm1, %v1927_v2 }
  0x12   :  { %1772 = vmatprep.subr.bf16.mxu1 %v1928_v11  ;;  %553 = vmatprep.mubr.f32.mxu0 %v1927_v2 }
  0x13   :  { %1781 = vmatprep.subr.bf16.mxu0 %v1928_v11  ;;  %1590 = vmatmul.mubr.msk.f32.vlgmr.msra.gmra.mrb[6].mxu0 %vm35_vm0, %v1589_v57 }
  0x14   :  { %1783 = vmatpush3.bf16.msra.mxu0 %v2017_v10  ;;  %1692 = vmatprep.mubr.msk.f32.mxu0 %vm1929_vm1, %v1927_v2 }
  0x15   :  { %1774 = vmatpush3.bf16.msra.mxu1 %v2028_v14  ;;  %1784 = vmatprep.subr.bf16.mxu0 %v1928_v11 }
  0x16   :  { %1775 = vmatprep.subr.bf16.mxu1 %v1928_v11 }
  0x18   :  { %1671 = vmatmul.mubr.f32.vlgmr.msra.gmra.mrb[8].mxu1 %v1927_v2  ;;  %1786 = vmatpush3.bf16.msra.mxu0 %v2028_v14 }
  0x19   :  { %1777 = vmatpush3.bf16.msra.mxu1 %v2017_v10  ;;  %1681 = vmatprep.mubr.msk.f32.mxu1 %vm1929_vm1, %v1927_v2 }
  0x1a   :  { %1778 = vmatprep.subr.bf16.mxu1 %v1928_v11  ;;  %1793 = vmatprep.subr.bf16.mxu0 %v1928_v11 }
  0x1d   :  { %1780 = vmatpush3.bf16.msra.mxu1 %v2028_v14 }
  0x1e   :  { %1787 = vmatprep.subr.bf16.mxu1 %v1928_v11 }
  0xd9   :  { %v105_v15 = vpop.f32.mrb[0].mxu0 }
  0xda   :  { %v107_v17 = vpop.f32.mrb[1].mxu0  ;;  %v106_v24 = vadd.f32 %v105_v15, %v2055_v23 }
  0xe3   :  { %v2050_v21 = vpop.f32.mrb[6].mxu1 }
  0xe4   :  { %v2052_v22 = vpop.f32.mrb[7].mxu1 }
  0xeb   :  { %v709_v25 = vpop.f32.mrb[8].mxu1 }
  0xec   :  { %v713_v26 = vadd.f32 %v709_v25, %v106_v24  ;;  %v1672_v27 = vpop.f32.mrb[9].mxu1 }
  0xee   :  { %1855 = vtanh.f32 %v713_v26  ;;  %v1593_v29 = vmul.f32 -1.442695, %v713_v26 }
  0xf0   :  { %1857 = vpow2.f32 %v1593_v29 }
  0xf8   :  { %v1856_v28 = vpop.eup %1855 }
  0xf9   :  { %723 = vrot.lane.b32.xlu0 %v1856_v28, %s1930_s15 }
  0xfa   :  { %v1858_v30 = vpop.eup %1857 }
  0xfb   :  { %v717_v31 = vadd.f32 1.0, %v1858_v30 }
  0xfd   :  { %1859 = vrcp.f32 %v717_v31 }
 0x107   :  { %v1860_v32 = vpop.eup %1859 }
 0x108   :  { %v721_v35 = vmul.f32 0.0, %v1860_v32 }
 0x16b   :  { %v724_v33 = vpop.permute.xlu0 %723 }
 0x16c   :  { %v726_v34 = vmul.f32 %v1860_v32, %v724_v33 }
 0x16e   :  { %728 = vrot.lane.b32.xlu0 %v726_v34, %s1931_s16 }
 0x1e0   :  { %v729_v36 = vpop.permute.xlu0 %728 }
 0x1e1   :  { %v731_v37 = vadd.f32 %v729_v36, %v721_v35 }
 0x1e3   :  { %1861 = vtanh.f32 %v731_v37 }
 0x1ed   :  { %v1862_v38 = vpop.eup %1861 }
 0x1ee   :  { %734 = vrot.lane.b32.xlu1 %v1862_v38, %s1930_s15 }
 0x260   :  { %v735_v39 = vpop.permute.xlu1 %734 }
 0x261   :  { %v737_v40 = vmul.f32 %v1860_v32, %v735_v39 }
 0x263   :  { %739 = vrot.lane.b32.xlu1 %v737_v40, %s1931_s16 }
 0x2d5   :  { %v740_v41 = vpop.permute.xlu1 %739 }
 0x2d6   :  { %1682 = vmatmul.mubr.msk.f32.vlgmr.msra.gmra.mrb[0].mxu1 %vm639_vm2, %v740_v41 }
 0x2d7   :  { %1789 = vmatpush3.bf16.msra.mxu1 %v2017_v10  ;;  %1703 = vmatprep.mubr.msk.f32.mxu1 %vm1929_vm1, %v1927_v2 }
 0x2d8   :  { %1790 = vmatprep.subr.bf16.mxu1 %v1928_v11 }
 0x2db   :  { %1792 = vmatpush3.bf16.msra.mxu1 %v2028_v14 }
 0x2dc   :  { %1799 = vmatprep.subr.bf16.mxu1 %v1928_v11 }
 0x3a9   :  { %v809_v42 = vpop.f32.mrb[0].mxu1 }
 0x3aa   :  { %v1831_v43 = vadd.f32 %v809_v42, %v2055_v23  ;;  %v1683_v44 = vpop.f32.mrb[1].mxu1 }
 0x3ac   :  { %1863 = vtanh.f32 %v1831_v43  ;;  %v1595_v46 = vmul.f32 -1.442695, %v1831_v43 }
 0x3ae   :  { %1865 = vpow2.f32 %v1595_v46 }
 0x3b6   :  { %v1864_v45 = vpop.eup %1863 }
 0x3b7   :  { %823 = vrot.lane.b32.xlu0 %v1864_v45, %s1930_s15 }
 0x3b8   :  { %v1866_v47 = vpop.eup %1865 }
 0x3b9   :  { %v817_v48 = vadd.f32 1.0, %v1866_v47 }
 0x3bb   :  { %1867 = vrcp.f32 %v817_v48 }
 0x3c5   :  { %v1868_v49 = vpop.eup %1867 }
 0x3c6   :  { %v821_v52 = vmul.f32 %v1868_v49, %v731_v37 }
 0x429   :  { %v824_v50 = vpop.permute.xlu0 %823 }
 0x42a   :  { %v826_v51 = vmul.f32 %v1868_v49, %v824_v50 }
 0x42c   :  { %828 = vrot.lane.b32.xlu1 %v826_v51, %s1931_s16 }
 0x49e   :  { %v829_v53 = vpop.permute.xlu1 %828 }
 0x49f   :  { %v831_v54 = vadd.f32 %v829_v53, %v821_v52 }
 0x4a1   :  { %1869 = vtanh.f32 %v831_v54 }
 0x4ab   :  { %v1870_v58 = vpop.eup %1869 }
 0x4ac   :  { %834 = vrot.lane.b32.xlu0 %v1870_v58, %s1930_s15 }
 0x51e   :  { %v835_v59 = vpop.permute.xlu0 %834 }
 0x51f   :  { %v837_v60 = vmul.f32 %v1868_v49, %v835_v59 }
 0x521   :  { %839 = vrot.lane.b32.xlu1 %v837_v60, %s1931_s16 }
 0x593   :  { %v840_v61 = vpop.permute.xlu1 %839 }
 0x594   :  { %1693 = vmatmul.mubr.msk.f32.vlgmr.msra.gmra.mrb[2].mxu0 %vm639_vm2, %v840_v61 }
 0x595   :  { %1795 = vmatpush3.bf16.msra.mxu0 %v2017_v10  ;;  %1714 = vmatprep.mubr.msk.f32.mxu0 %vm1929_vm1, %v1927_v2 }
 0x596   :  { %1796 = vmatprep.subr.bf16.mxu0 %v1928_v11 }
 0x599   :  { %1798 = vmatpush3.bf16.msra.mxu0 %v2028_v14 }
 0x59a   :  { %1805 = vmatprep.subr.bf16.mxu0 %v1928_v11 }
 0x667   :  { %v909_v62 = vpop.f32.mrb[2].mxu0 }
 0x668   :  { %v1832_v63 = vadd.f32 %v909_v62, %v2055_v23  ;;  %v1694_v0 = vpop.f32.mrb[3].mxu0 }
 0x66a   :  { %1871 = vtanh.f32 %v1832_v63  ;;  %v1597_v3 = vmul.f32 -1.442695, %v1832_v63 }
 0x66c   :  { %1873 = vpow2.f32 %v1597_v3 }
 0x674   :  { %v1872_v1 = vpop.eup %1871 }
 0x675   :  { %923 = vrot.lane.b32.xlu0 %v1872_v1, %s1930_s15 }
 0x676   :  { %v1874_v4 = vpop.eup %1873 }
 0x677   :  { %v917_v5 = vadd.f32 1.0, %v1874_v4 }
 0x679   :  { %1875 = vrcp.f32 %v917_v5 }
 0x683   :  { %v1876_v6 = vpop.eup %1875 }
 0x684   :  { %v921_v9 = vmul.f32 %v1876_v6, %v831_v54 }
 0x6e7   :  { %v924_v7 = vpop.permute.xlu0 %923 }
 0x6e8   :  { %v926_v8 = vmul.f32 %v1876_v6, %v924_v7 }
 0x6ea   :  { %928 = vrot.lane.b32.xlu1 %v926_v8, %s1931_s16 }
 0x75c   :  { %v929_v12 = vpop.permute.xlu1 %928 }
 0x75d   :  { %v931_v13 = vadd.f32 %v929_v12, %v921_v9 }
 0x75f   :  { %1877 = vtanh.f32 %v931_v13 }
 0x769   :  { %v1878_v15 = vpop.eup %1877 }
 0x76a   :  { %934 = vrot.lane.b32.xlu0 %v1878_v15, %s1930_s15 }
 0x7dc   :  { %v935_v16 = vpop.permute.xlu0 %934 }
 0x7dd   :  { %v937_v17 = vmul.f32 %v1876_v6, %v935_v16 }
 0x7df   :  { %939 = vrot.lane.b32.xlu1 %v937_v17, %s1931_s16 }
 0x851   :  { %v940_v19 = vpop.permute.xlu1 %939 }
 0x852   :  { %1704 = vmatmul.mubr.msk.f32.vlgmr.msra.gmra.mrb[2].mxu1 %vm639_vm2, %v940_v19 }
 0x853   :  { %1801 = vmatpush3.bf16.msra.mxu1 %v2017_v10  ;;  %1725 = vmatprep.mubr.msk.f32.mxu1 %vm1929_vm1, %v1927_v2 }
 0x854   :  { %1802 = vmatprep.subr.bf16.mxu1 %v1928_v11 }
 0x857   :  { %1804 = vmatpush3.bf16.msra.mxu1 %v2028_v14 }
 0x858   :  { %1811 = vmatprep.subr.bf16.mxu1 %v1928_v11 }
 0x925   :  { %v1009_v24 = vpop.f32.mrb[2].mxu1 }
 0x926   :  { %v1833_v25 = vadd.f32 %v1009_v24, %v2055_v23  ;;  %v1705_v26 = vpop.f32.mrb[3].mxu1 }
 0x928   :  { %1879 = vtanh.f32 %v1833_v25  ;;  %v1599_v28 = vmul.f32 -1.442695, %v1833_v25 }
 0x92a   :  { %1881 = vpow2.f32 %v1599_v28 }
 0x932   :  { %v1880_v27 = vpop.eup %1879 }
 0x933   :  { %1023 = vrot.lane.b32.xlu0 %v1880_v27, %s1930_s15 }
 0x934   :  { %v1882_v29 = vpop.eup %1881 }
 0x935   :  { %v1017_v30 = vadd.f32 1.0, %v1882_v29 }
 0x937   :  { %1883 = vrcp.f32 %v1017_v30 }
 0x941   :  { %v1884_v31 = vpop.eup %1883 }
 0x942   :  { %v1021_v34 = vmul.f32 %v1884_v31, %v931_v13 }
 0x9a5   :  { %v1024_v32 = vpop.permute.xlu0 %1023 }
 0x9a6   :  { %v1026_v33 = vmul.f32 %v1884_v31, %v1024_v32 }
 0x9a8   :  { %1028 = vrot.lane.b32.xlu1 %v1026_v33, %s1931_s16 }
 0xa1a   :  { %v1029_v35 = vpop.permute.xlu1 %1028 }
 0xa1b   :  { %v1031_v36 = vadd.f32 %v1029_v35, %v1021_v34  ;;  %v31_v34 = vsub.s32 1, %v2042_v18  ;;  %v631_v35 = vadd.f32 %v2050_v21, %v2055_v23 }
 0xa1d   :  { %1885 = vtanh.f32 %v1031_v36 }
 0xa27   :  { %v1886_v37 = vpop.eup %1885 }
 0xa28   :  { %1034 = vrot.lane.b32.xlu0 %v1886_v37, %s1930_s15 }
 0xa9a   :  { %v1035_v38 = vpop.permute.xlu0 %1034 }
 0xa9b   :  { %v1037_v39 = vmul.f32 %v1884_v31, %v1035_v38 }
 0xa9d   :  { %1039 = vrot.lane.b32.xlu1 %v1037_v39, %s1931_s16 }
 0xb0f   :  { %v1040_v40 = vpop.permute.xlu1 %1039 }
 0xb10   :  { %1715 = vmatmul.mubr.msk.f32.vlgmr.msra.gmra.mrb[4].mxu0 %vm639_vm2, %v1040_v40 }
 0xb11   :  { %1807 = vmatpush3.bf16.msra.mxu0 %v2017_v10  ;;  %1736 = vmatprep.mubr.msk.f32.mxu0 %vm1929_vm1, %v1927_v2 }
 0xb12   :  { %1808 = vmatprep.subr.bf16.mxu0 %v1928_v11 }
 0xb15   :  { %1810 = vmatpush3.bf16.msra.mxu0 %v2028_v14 }
 0xb16   :  { %1817 = vmatprep.subr.bf16.mxu0 %v1928_v11 }
 0xbe3   :  { %v1109_v41 = vpop.f32.mrb[4].mxu0 }
 0xbe4   :  { %v1834_v42 = vadd.f32 %v1109_v41, %v2055_v23  ;;  %v1716_v43 = vpop.f32.mrb[5].mxu0 }
 0xbe6   :  { %1887 = vtanh.f32 %v1834_v42  ;;  %v1601_v45 = vmul.f32 -1.442695, %v1834_v42 }
 0xbe8   :  { %1889 = vpow2.f32 %v1601_v45 }
 0xbf0   :  { %v1888_v44 = vpop.eup %1887 }
 0xbf1   :  { %1123 = vrot.lane.b32.xlu0 %v1888_v44, %s1930_s15 }
 0xbf2   :  { %v1890_v46 = vpop.eup %1889 }
 0xbf3   :  { %v1117_v47 = vadd.f32 1.0, %v1890_v46 }
 0xbf5   :  { %1891 = vrcp.f32 %v1117_v47 }
 0xbff   :  { %v1892_v48 = vpop.eup %1891 }
 0xc00   :  { %v1121_v51 = vmul.f32 %v1892_v48, %v1031_v36  ;;  %v32_v36 = vrot.slane %v2048_v20, %v31_v34 }
 0xc02   :  { %v633_v40 = vadd.f32 %v2052_v22, %v32_v36 }
 0xc04   :  { %v1608_v18 = vmul.f32 -1.442695, %v633_v40 }
 0xc63   :  { %v1124_v49 = vpop.permute.xlu0 %1123 }
 0xc64   :  { %v1126_v50 = vmul.f32 %v1892_v48, %v1124_v49 }
 0xc66   :  { %1128 = vrot.lane.b32.xlu1 %v1126_v50, %s1931_s16 }
 0xcd8   :  { %v1129_v52 = vpop.permute.xlu1 %1128 }
 0xcd9   :  { %v1131_v53 = vadd.f32 %v1129_v52, %v1121_v51 }
 0xcdb   :  { %1893 = vtanh.f32 %v1131_v53 }
 0xce5   :  { %v1894_v54 = vpop.eup %1893 }
 0xce6   :  { %1134 = vrot.lane.b32.xlu0 %v1894_v54, %s1930_s15  ;;  %v1470_v54 = vld [vmem:[%s2210_s3] sm:$0xff] }
 0xd58   :  { %v1135_v55 = vpop.permute.xlu0 %1134 }
 0xd59   :  { %v1137_v56 = vmul.f32 %v1892_v48, %v1135_v55  ;;  %v1471_v55 = vld [vmem:[%s2210_s3 + $0x8] sm:$0xff] }
 0xd5b   :  { %1139 = vrot.lane.b32.xlu1 %v1137_v56, %s1931_s16  ;;  %v1472_v56 = vld [vmem:[%s2210_s3 + $0x10] sm:$0xff] }
 0xdcd   :  { %v1140_v57 = vpop.permute.xlu1 %1139 }
 0xdce   :  { %1726 = vmatmul.mubr.msk.f32.vlgmr.msra.gmra.mrb[4].mxu1 %vm639_vm2, %v1140_v57  ;;  %v1818_v57 = vpack.c.bf16 %v1471_v55, %v1470_v54 }
 0xdcf   :  { %1813 = vmatpush3.bf16.msra.mxu1 %v2017_v10  ;;  %1747 = vmatprep.mubr.msk.f32.mxu1 %vm1929_vm1, %v1927_v2 }
 0xdd0   :  { %1814 = vmatprep.subr.bf16.mxu1 %v1928_v11 }
 0xdd3   :  { %1816 = vmatpush3.bf16.msra.mxu1 %v2028_v14 }
 0xea1   :  { %v1209_v58 = vpop.f32.mrb[4].mxu1 }
 0xea2   :  { %v1835_v59 = vadd.f32 %v1209_v58, %v2055_v23  ;;  %v1727_v60 = vpop.f32.mrb[5].mxu1  ;;  %v1473_v58 = vld [vmem:[%s2210_s3 + $0x18] sm:$0xff] }
 0xea4   :  { %1895 = vtanh.f32 %v1835_v59  ;;  %v1603_v62 = vmul.f32 -1.442695, %v1835_v59  ;;  %v1821_v59 = vpack.c.bf16 %v1473_v58, %v1472_v56 }
 0xea6   :  { %1897 = vpow2.f32 %v1603_v62 }
 0xeae   :  { %v1896_v61 = vpop.eup %1895 }
 0xeaf   :  { %1223 = vrot.lane.b32.xlu0 %v1896_v61, %s1930_s15 }
 0xeb0   :  { %v1898_v63 = vpop.eup %1897 }
 0xeb1   :  { %v1217_v0 = vadd.f32 1.0, %v1898_v63  ;;  %v1474_v63 = vld [vmem:[%s2210_s3 + $0x20] sm:$0xff] }
 0xeb3   :  { %1899 = vrcp.f32 %v1217_v0  ;;  %v1475_v0 = vld [vmem:[%s2210_s3 + $0x28] sm:$0xff] }
 0xebd   :  { %v1900_v10 = vpop.eup %1899 }
 0xebe   :  { %v1221_v4 = vmul.f32 %v1900_v10, %v1131_v53 }
 0xf21   :  { %v1224_v1 = vpop.permute.xlu0 %1223 }
 0xf22   :  { %v1226_v3 = vmul.f32 %v1900_v10, %v1224_v1  ;;  %v1476_v1 = vld [vmem:[%s2210_s3 + $0x30] sm:$0xff] }
 0xf24   :  { %1228 = vrot.lane.b32.xlu1 %v1226_v3, %s1931_s16  ;;  %v1477_v3 = vld [vmem:[%s2210_s3 + $0x38] sm:$0xff] }
 0xf96   :  { %v1229_v14 = vpop.permute.xlu1 %1228 }
 0xf97   :  { %v1231_v5 = vadd.f32 %v1229_v14, %v1221_v4  ;;  %v1827_v4 = vpack.c.bf16 %v1477_v3, %v1476_v1 }
 0xf99   :  { %1901 = vtanh.f32 %v1231_v5 }
 0xfa3   :  { %v1902_v6 = vpop.eup %1901 }
 0xfa4   :  { %1234 = vrot.lane.b32.xlu0 %v1902_v6, %s1930_s15 }
0x1016   :  { %v1235_v7 = vpop.permute.xlu0 %1234 }
0x1017   :  { %v1237_v8 = vmul.f32 %v1900_v10, %v1235_v7  ;;  %v1824_v10 = vpack.c.bf16 %v1475_v0, %v1474_v63 }
0x1019   :  { %1239 = vrot.lane.b32.xlu1 %v1237_v8, %s1931_s16 }
0x108b   :  { %v1240_v9 = vpop.permute.xlu1 %1239 }
0x108c   :  { %1737 = vmatmul.mubr.msk.f32.vlgmr.msra.gmra.mrb[6].mxu0 %vm639_vm2, %v1240_v9  ;;  %v1609_v9 = vld [vmem:[%s2209_s4 + $0x1] ss:$0 sm:$0xff] }
0x108d   :  { %1766 = vmatprep.mubr.msk.f32.mxu0 %vm1929_vm1, %v1927_v2  ;;  %1819 = vmatpush3.bf16.msra.mxu0 %v1818_v57 }
0x108e   :  { %1820 = vmatprep.subr.bf16.mxu0 %v1928_v11 }
0x1091   :  { %1822 = vmatpush3.bf16.msra.mxu0 %v1821_v59 }
0x1092   :  { %1823 = vmatprep.subr.bf16.mxu0 %v1928_v11 }
0x1095   :  { %1825 = vmatpush3.bf16.msra.mxu0 %v1824_v10 }
0x1096   :  { %1826 = vmatprep.subr.bf16.mxu0 %v1928_v11 }
0x1099   :  { %1828 = vmatpush3.bf16.msra.mxu0 %v1827_v4 }
0x115f   :  { %v1309_v12 = vpop.f32.mrb[6].mxu0 }
0x1160   :  { %v1836_v13 = vadd.f32 %v1309_v12, %v2055_v23  ;;  %v1738_v15 = vpop.f32.mrb[7].mxu0 }
0x1161   :  { %v1611_v15 = vld [vmem:[%s2209_s4 + $0x2] ss:$0 sm:$0xff] }
0x1162   :  { %1903 = vtanh.f32 %v1836_v13  ;;  %v1605_v17 = vmul.f32 -1.442695, %v1836_v13 }
0x1164   :  { %1905 = vpow2.f32 %v1605_v17 }
0x116c   :  { %v1904_v16 = vpop.eup %1903 }
0x116d   :  { %1323 = vrot.lane.b32.xlu0 %v1904_v16, %s1930_s15 }
0x116e   :  { %v1906_v19 = vpop.eup %1905 }
0x116f   :  { %v1317_v24 = vadd.f32 1.0, %v1906_v19 }
0x1171   :  { %1907 = vrcp.f32 %v1317_v24  ;;  %v1612_v24 = vld [vmem:[%s2209_s4 + $0x3] ss:$0 sm:$0xff] }
0x117b   :  { %v1908_v25 = vpop.eup %1907 }
0x117c   :  { %v1321_v28 = vmul.f32 %v1908_v25, %v1231_v5 }
0x11df   :  { %v1324_v26 = vpop.permute.xlu0 %1323 }
0x11e0   :  { %v1326_v27 = vmul.f32 %v1908_v25, %v1324_v26 }
0x11e2   :  { %1328 = vrot.lane.b32.xlu1 %v1326_v27, %s1931_s16 }
0x1254   :  { %v1329_v2 = vpop.permute.xlu1 %1328 }
0x1255   :  { %v1331_v29 = vadd.f32 %v1329_v2, %v1321_v28 }
0x1257   :  { %1909 = vtanh.f32 %v1331_v29 }
0x1261   :  { %v1910_v30 = vpop.eup %1909 }
0x1262   :  { %1334 = vrot.lane.b32.xlu0 %v1910_v30, %s1930_s15 }
0x12d4   :  { %v1335_v31 = vpop.permute.xlu0 %1334 }
0x12d5   :  { %v1337_v32 = vmul.f32 %v1908_v25, %v1335_v31 }
0x12d7   :  { %1339 = vrot.lane.b32.xlu1 %v1337_v32, %s1931_s16 }
0x1349   :  { %v1340_v33 = vpop.permute.xlu1 %1339 }
0x134a   :  { %1748 = vmatmul.mubr.msk.f32.vlgmr.msra.gmra.mrb[10].mxu1 %vm639_vm2, %v1340_v33 }
0x141d   :  { %v1409_v37 = vpop.f32.mrb[10].mxu1 }
0x141e   :  { %v1413_v38 = vadd.f32 %v1409_v37, %v631_v35  ;;  %v1749_v39 = vpop.f32.mrb[11].mxu1 }
0x1420   :  { %1911 = vtanh.f32 %v1413_v38  ;;  %v1607_v43 = vmul.f32 -1.442695, %v1413_v38 }
0x1421   :  { %1913 = vtanh.f32 %v633_v40 }
0x1422   :  { %1915 = vpow2.f32 %v1607_v43 }
0x1423   :  { %1917 = vpow2.f32 %v1608_v18 }
0x142a   :  { %v1912_v41 = vpop.eup %1911 }
0x142b   :  { %1423 = vrot.lane.b32.xlu0 %v1912_v41, %s1930_s15  ;;  %v1914_v42 = vpop.eup %1913 }
0x142c   :  { %v1916_v21 = vpop.eup %1915 }
0x142d   :  { %v1417_v23 = vadd.f32 1.0, %v1916_v21  ;;  %v1918_v20 = vpop.eup %1917 }
0x142e   :  { %v1441_v44 = vadd.f32 1.0, %v1918_v20 }
0x142f   :  { %1446 = vrot.lane.b32.xlu0 %v1914_v42, %s1930_s15  ;;  %1919 = vrcp.f32 %v1417_v23 }
0x1430   :  { %1921 = vrcp.f32 %v1441_v44 }
0x1439   :  { %v1920_v45 = vpop.eup %1919 }
0x143a   :  { %v1922_v47 = vpop.eup %1921  ;;  %v1421_v51 = vmul.f32 %v1920_v45, %v1331_v29 }
0x149d   :  { %v1424_v22 = vpop.permute.xlu0 %1423 }
0x149e   :  { %v1426_v46 = vmul.f32 %v1920_v45, %v1424_v22 }
0x14a0   :  { %1428 = vrot.lane.b32.xlu1 %v1426_v46, %s1931_s16 }
0x14a1   :  { %v1447_v48 = vpop.permute.xlu0 %1446 }
0x14a2   :  { %v1449_v49 = vmul.f32 %v1922_v47, %v1447_v48 }
0x14a4   :  { %1923 = vtanh.f32 %v1449_v49 }
0x14ae   :  { %v1924_v50 = vpop.eup %1923 }
0x14af   :  { %1452 = vrot.lane.b32.xlu0 %v1924_v50, %s1932_s0 }
0x1512   :  { %v1429_v52 = vpop.permute.xlu1 %1428 }
0x1513   :  { %v1431_v53 = vadd.f32 %v1429_v52, %v1421_v51 }
0x1515   :  { %1925 = vtanh.f32 %v1431_v53 }
0x151f   :  { %v1926_v60 = vpop.eup %1925 }
0x1520   :  { %1434 = vrot.lane.b32.xlu1 %v1926_v60, %s1930_s15 }
0x1521   :  { %v1453_v61 = vpop.permute.xlu0 %1452 }
0x1522   :  { %v1455_v62 = vmul.f32 %v1922_v47, %v1453_v61 }
0x1524   :  { %1463 = vrot.lane.b32.xlu0 %v1455_v62, %s1930_s15 }
0x1592   :  { %v1435_v14 = vpop.permute.xlu1 %1434 }
0x1593   :  { %v1437_v5 = vmul.f32 %v1920_v45, %v1435_v14 }
0x1595   :  { %1457 = vrot.lane.b32.xlu1 %v1437_v5, %s1931_s16 }
0x1596   :  { %v1464_v7 = vpop.permute.xlu0 %1463 }
0x1607   :  { %v1458_v6 = vpop.permute.xlu1 %1457 }
0x1608   :  { %1461 = vst.msk [vmem:[#allocation2] sm:$0x3] %vm1460_vm3, %v1458_v6 }
0x1609   :  { %1467 = vst.msk [vmem:[#allocation2] sm:$0x3] %vm1466_vm4, %v1464_v7 }
0x1610   :  { %v1469_v8 = vld [vmem:[#allocation2] sm:$0x3] }
0x1611   :  { %1767 = vmatmul.mubr.msk.f32.vlgmr.msra.gmra.mrb[8].mxu0 %vm1482_vm5, %v1469_v8 }
0x16e4   :  { %v1552_v11 = vpop.f32.mrb[8].mxu0 }
0x16e5   :  { %v1553_v12 = vadd.f32 %v1609_v9, %v1552_v11  ;;  %v1768_v13 = vpop.f32.mrb[9].mxu0 }
0x16e7   :  { %v1556_v16 = vmax.f32 %v1553_v12, 0.0 }
0x16e9   :  { %v1563_v17 = vmul.f32 %v1611_v15, %v1556_v16 }
0x16eb   :  { %v1564_v19 = vsel %vm1460_vm3, %v1563_v17, 0.0 }
0x16ec   :  { %1565 = vadd.xlane.f32.xlu1 %v1564_v19 }
0x1779   :  { %v1566_v25 = vpop.xlane.xlu1 %1565 }
0x177a   :  { %v1571_v26 = vadd.f32 %v1612_v24, %v1566_v25 }
0x177c   :  { %1573 = vst.msk [vmem:[%s2211_s5] sm:$0x3] %vm1572_vm6, %v1571_v26 }

</bundles_post_ra>
